<compile_context>
chip_gen: v5e
topology: v5e:2x2
jax: 0.10.0
libtpu: 0.0.40
codegen_flags: <defaults>
</compile_context>

<pallas_src>
import functools
import math

import jax
import jax.numpy as jnp
from jax import lax
from jax.experimental import pallas as pl
from jax.experimental.pallas import tpu as pltpu


def _round_up(x, m):
    return ((x + m - 1) // m) * m


# -----------------------------------------------------------------------------
# Pallas kernel 1: FUSED pairwise-squared-distance + radius test -> int32 index
#   idx[b, n, m] = m                if ||src[b,n]-dst[b,m]||^2 <= r^2
#                = sentinel (=Np)   otherwise
# (this is exactly the tensor both get_normals and query_ball_point sort)
# -----------------------------------------------------------------------------
def _ball_idx_kernel(src_ref, s2_ref, dstT_ref, d2_ref, out_ref, *, r2, sentinel):
    tn = out_ref.shape[1]
    tm = out_ref.shape[2]
    src = src_ref[0]                      # [TN, 3]   (lane-sparse but tiny)
    dst_t = dstT_ref[0]                   # [3, TM]   (lane-dense)
    # ||a||^2 + ||b||^2 - 2ab, same expansion as the torch reference.
    dist = s2_ref[0] + d2_ref[0]          # [TN,1] + [1,TM] -> [TN, TM]
    for c in range(src.shape[1]):         # C=3: VPU broadcast FMAs, no MXU
        dist = dist - 2.0 * (src[:, c:c + 1] * dst_t[c:c + 1, :])
    col = lax.broadcasted_iota(jnp.int32, (tn, tm), 1) + pl.program_id(2) * tm
    out_ref[0] = jnp.where(dist > r2, jnp.int32(sentinel), col)


def pallas_ball_group_idx(query, points, radius):
    """query [B, Nq, 3], points [B, Np, 3] -> int32 [B, Nq, Np] group indices
    (column index where sqrdist <= radius^2, else Np), matching the torch
    `group_idx[sqrdists > r**2] = N` pattern before the sort."""
    B, Nq, C = query.shape
    Np = points.shape[1]
    TN = min(_round_up(Nq, 8), 512)        # sublane tile
    TM = min(_round_up(Np, 128), 1024)     # lane-dense tile
    Nq_pad = _round_up(Nq, TN)
    Np_pad = _round_up(Np, TM)
    q = query if Nq_pad == Nq else jnp.pad(query, ((0, 0), (0, Nq_pad - Nq), (0, 0)))
    p = points if Np_pad == Np else jnp.pad(points, ((0, 0), (0, Np_pad - Np), (0, 0)))
    # precomputed norms (wrapper-side, trivial) -> no per-tile recomputation
    q_sq = jnp.sum(q * q, axis=-1, keepdims=True)          # [B, Nq_pad, 1]
    p_sq = jnp.sum(p * p, axis=-1)[:, None, :]              # [B, 1, Np_pad]
    p_t = jnp.swapaxes(p, 1, 2)                              # [B, 3, Np_pad]

    kernel = functools.partial(_ball_idx_kernel, r2=float(radius) ** 2, sentinel=Np)

    cost = pl.CostEstimate(
        flops=int(9 * B * Nq_pad * Np_pad),
        transcendentals=0,
        bytes_accessed=int(4 * (B * Nq_pad * Np_pad                 # int32 out
                                + B * Nq_pad * (C + 1)
                                + B * Np_pad * (C + 1))))

    out = pl.pallas_call(
        kernel,
        out_shape=jax.ShapeDtypeStruct((B, Nq_pad, Np_pad), jnp.int32),
        grid=(B, Nq_pad // TN, Np_pad // TM),
        in_specs=[
            pl.BlockSpec((1, TN, C), lambda b, i, j: (b, i, 0)),
            pl.BlockSpec((1, TN, 1), lambda b, i, j: (b, i, 0)),
            pl.BlockSpec((1, C, TM), lambda b, i, j: (b, 0, j)),
            pl.BlockSpec((1, 1, TM), lambda b, i, j: (b, 0, j)),
        ],
        out_specs=pl.BlockSpec((1, TN, TM), lambda b, i, j: (b, i, j)),
        compiler_params=pltpu.CompilerParams(
            dimension_semantics=("parallel", "parallel", "parallel"),
            vmem_limit_bytes=48 * 1024 * 1024),   # safe on v5e/v6e (128 MiB) and v7x (64 MiB)
        cost_estimate=cost,
    )(q, q_sq, p_t, p_sq)
    return out[:, :Nq, :Np]


# -----------------------------------------------------------------------------
# Pallas kernel 2: FreqExtractMoudle 1x1-Conv1d MLP (1->16->32->16->1, BN folded)
# Points on the 128-lane axis, channels on sublanes; B flattened into the point
# axis; output stores are unmasked lane-dense.  TP capped at 512 so the widest
# [32, TP] f32 intermediate stays within 16 vregs (no spill).
# -----------------------------------------------------------------------------
def _freq_mlp_kernel(x_ref, w1_ref, b1_ref, w2_ref, b2_ref,
                     w3_ref, b3_ref, w4_ref, b4_ref, o_ref):
    x = x_ref[...]                                                   # [1, TP]
    h = jnp.maximum(w1_ref[...] * x + b1_ref[...], 0.0)             # [16, TP] (K=1, VPU)
    h = jnp.maximum(jnp.dot(w2_ref[...], h,
                            preferred_element_type=jnp.float32) + b2_ref[...], 0.0)   # [32, TP]
    h = jnp.maximum(jnp.dot(w3_ref[...], h,
                            preferred_element_type=jnp.float32) + b3_ref[...], 0.0)   # [16, TP]
    # last layer: BN folded, no ReLU -> sublane reduction (XLU), lane-dense store
    o_ref[...] = jnp.sum(w4_ref[...] * h, axis=0, keepdims=True) + b4_ref[...]        # [1, TP]


def pallas_freq_mlp(curv, fem_layers):
    """curv [B, N] -> [B, N]"""
    B, N = curv.shape
    (w1, b1), (w2, b2), (w3, b3), (w4, b4) = fem_layers   # w: (cin, cout), b: (1, cout)
    # weights as [cout, cin], biases as [cout, 1] for the channels-on-sublane layout
    args_w = [w1.T, b1.T, w2.T, b2.T, w3.T, b3.T, w4, b4.T]

    P_total = B * N
    TP = min(_round_up(P_total, 128), 512)     # <=16 vregs for the [32, TP] stage
    P = _round_up(P_total, TP)
    flat = curv.reshape(1, P_total)
    if P != P_total:
        flat = jnp.pad(flat, ((0, 0), (0, P - P_total)))

    args = [flat] + args_w
    in_specs = [pl.BlockSpec((1, TP), lambda i: (0, i))]
    for a in args_w:
        in_specs.append(pl.BlockSpec(a.shape, lambda i: (0, 0)))

    flops_per_pt = 2 * (1 * 16 + 16 * 32 + 32 * 16 + 16 * 1)
    cost = pl.CostEstimate(flops=int(flops_per_pt * P), transcendentals=0,
                           bytes_accessed=int(4 * 2 * P))

    out = pl.pallas_call(
        _freq_mlp_kernel,
        out_shape=jax.ShapeDtypeStruct((1, P), jnp.float32),
        grid=(P // TP,),
        in_specs=in_specs,
        out_specs=pl.BlockSpec((1, TP), lambda i: (0, i)),
        compiler_params=pltpu.CompilerParams(dimension_semantics=("parallel",)),
        cost_estimate=cost,
    )(*args)
    return out[0, :P_total].reshape(B, N)


# -----------------------------------------------------------------------------
# Pallas kernel 3: grouped-feature 1x1-Conv2d MLP stack + max over nsample (K)
# pointfeat [B, S, K, Cin] -> new_feature [B, S, Cout]
# Layout: points on the 128-lane axis (pf is [B, K, C, S_pad]); weights [cout,cin];
# output block (1, cout, TS) -> lane-dense unmasked stores; fori_loop over K.
# -----------------------------------------------------------------------------
def pallas_group_mlp(pointfeat, mlp_layers):
    B, S, K, C = pointfeat.shape
    nl = len(mlp_layers)
    cout = mlp_layers[-1][0].shape[1]

    TS = min(_round_up(S, 128), 512)                       # lane tile (multiple of 128)
    S_pad = _round_up(S, TS)
    pf = jnp.transpose(pointfeat, (0, 2, 3, 1))            # [B, K, C, S]  (points on lanes)
    if S_pad != S:
        pf = jnp.pad(pf, ((0, 0), (0, 0), (0, 0), (0, S_pad - S)))

    # weights pre-transposed to [cout, cin]; biases to [cout, 1]
    wts = [(w.T, b.T) for (w, b) in mlp_layers]

    def kernel(*refs):
        x_ref = refs[0]
        o_ref = refs[-1]
        wb = refs[1:-1]
        ws = [wb[2 * i][...] for i in range(nl)]           # resident weights (hoisted loads)
        bs = [wb[2 * i + 1][...] for i in range(nl)]

        def apply_mlp(h):                                  # [C, TS] -> [cout, TS]
            for w, b in zip(ws, bs):
                h = jnp.maximum(
                    jnp.dot(w, h, preferred_element_type=jnp.float32) + b, 0.0)
            return h

        def body(k, acc):                                  # max over nsample (K)
            return jnp.maximum(acc, apply_mlp(x_ref[0, k]))

        acc0 = apply_mlp(x_ref[0, 0])
        o_ref[0] = lax.fori_loop(1, K, body, acc0, unroll=True)

    args = [pf]
    in_specs = [pl.BlockSpec((1, K, C, TS), lambda b, s: (b, 0, 0, s))]
    for wT, bT in wts:
        args += [wT, bT]
        in_specs.append(pl.BlockSpec(wT.shape, lambda b, s: (0, 0)))
        in_specs.append(pl.BlockSpec(bT.shape, lambda b, s: (0, 0)))

    flops = 2 * B * K * S_pad * sum(int(w.shape[0]) * int(w.shape[1]) for w, _ in mlp_layers)
    cost = pl.CostEstimate(flops=int(flops), transcendentals=0,
                           bytes_accessed=int(4 * (B * K * S_pad * C + B * S_pad * cout)))

    out = pl.pallas_call(
        kernel,
        out_shape=jax.ShapeDtypeStruct((B, cout, S_pad), jnp.float32),
        grid=(B, S_pad // TS),
        in_specs=in_specs,
        out_specs=pl.BlockSpec((1, cout, TS), lambda b, s: (b, 0, s)),
        compiler_params=pltpu.CompilerParams(
            dimension_semantics=("parallel", "parallel"),
            vmem_limit_bytes=48 * 1024 * 1024),
        cost_estimate=cost,
    )(*args)
    return jnp.swapaxes(out, 1, 2)[:, :S, :]              # [B, S, cout]


# -----------------------------------------------------------------------------
# Plain-JAX glue reproducing the PyTorch helpers
# -----------------------------------------------------------------------------
def index_points(points, idx):
    """points [B, N, C], idx [B, ...] -> [B, ..., C]"""
    B = points.shape[0]
    batch = jnp.arange(B).reshape((B,) + (1,) * (idx.ndim - 1))
    return points[batch, idx]


def get_normals(radius, nsample, xyz):
    B, N, C = xyz.shape
    # fused Pallas kernel: distance + radius mask -> int32 neighbor indices
    group_idx = pallas_ball_group_idx(xyz, xyz, radius)            # [B, N, N] int32
    group_idx = jnp.sort(group_idx, axis=-1)[:, :, :nsample]
    group_first = jnp.broadcast_to(group_idx[:, :, 0:1], group_idx.shape)
    group_idx = jnp.where(group_idx == N, group_first, group_idx)
    group_points = index_points(xyz, group_idx)                    # [B, N, k, 3]
    center = jnp.mean(group_points, axis=2, keepdims=True)
    centered = group_points - center
    cov = jnp.einsum("bnkc,bnkd->bncd", centered, centered)
    # TODO(synk): eigendecomposition has no Pallas equivalent; jnp.linalg.eigh is
    #             used here (eigenvector signs ambiguous vs torch.linalg.eigh).
    _, eigvecs = jnp.linalg.eigh(cov)
    return eigvecs[..., 0]                                         # [B, N, 3]


def get_curvate(pointcloud, large_scale, small_scale):
    points = pointcloud[:, :, :3]
    small_n = get_normals(small_scale, 32, points)
    large_n = get_normals(large_scale, 64, points)
    diff = (small_n - large_n) / 2.0
    return jnp.linalg.norm(diff, axis=2)                           # [B, N]


def farthest_point_sample(xyz, npoint):
    B, N, _ = xyz.shape

    def body(i, state):
        centroids, distance, farthest = state
        centroids = centroids.at[:, i].set(farthest)
        centroid = xyz[jnp.arange(B), farthest, :][:, None, :]     # [B, 1, 3]
        dist = jnp.sum((xyz - centroid) ** 2, axis=-1)
        distance = jnp.minimum(distance, dist)
        farthest = jnp.argmax(distance, axis=-1).astype(jnp.int32)
        return centroids, distance, farthest

    centroids = jnp.zeros((B, npoint), dtype=jnp.int32)
    distance = jnp.full((B, N), 1e10, dtype=jnp.float32)
    # TODO(synk): torch uses randint for the FPS start point; fixed to 0 for determinism.
    farthest = jnp.zeros((B,), dtype=jnp.int32)
    centroids, _, _ = lax.fori_loop(0, npoint, body, (centroids, distance, farthest))
    return centroids


def query_ball_point(radius, nsample, xyz, new_xyz):
    B, N, _ = xyz.shape
    group_idx = pallas_ball_group_idx(new_xyz, xyz, radius)        # [B, S, N] int32 (fused)
    group_idx = jnp.sort(group_idx, axis=-1)[:, :, :nsample]
    group_first = jnp.broadcast_to(group_idx[:, :, 0:1], group_idx.shape)
    group_idx = jnp.where(group_idx == N, group_first, group_idx)
    return group_idx


def freq_extract(x, fem_layers, small, large):
    pointxyz = x[:, :, :3]
    curv = get_curvate(pointxyz, large, small)                     # [B, N]
    return pallas_freq_mlp(curv, fem_layers)                       # [B, N]


# -----------------------------------------------------------------------------
# LayeredExtractMoudle forward (all_extra=False path)
# -----------------------------------------------------------------------------
def layered_extract_forward(x, feature, fem_layers, mlp_layers, *,
                            npoint, density_list, sample_num, radiu,
                            small, large, block_num):
    B, N, _ = x.shape
    freq_vect = freq_extract(x, fem_layers, small, large)          # [B, N]
    sorted_indices = jnp.argsort(freq_vect, axis=1)                # [B, N]
    block_size = N // block_num
    density_total = float(sum(density_list))

    concat_idx = []
    for i in range(block_num):
        indices = sorted_indices[:, i * block_size:(i + 1) * block_size]
        # TODO(synk): original keypoint count is density*volume (data-dependent shape);
        #             replaced by a static density-proportional split of npoint.
        key_num = int(npoint * density_list[i] / density_total)
        block_pts = index_points(x, indices)[:, :, :3]
        pointindex = farthest_point_sample(block_pts, key_num)     # [B, key_num]
        idx_i = index_points(indices[..., None], pointindex)[..., 0]
        concat_idx.append(idx_i)
    keypoint_idx = jnp.concatenate(concat_idx, axis=1)             # [B, S]

    new_xyz = index_points(x, keypoint_idx)                        # [B, S, 3]
    idx = query_ball_point(radiu, sample_num, x, new_xyz)          # [B, S, K]
    pointfeat = index_points(feature, idx)                         # [B, S, K, C1]
    new_feature = pallas_group_mlp(pointfeat, mlp_layers)          # [B, S, Cout]
    return new_xyz, new_feature


# -----------------------------------------------------------------------------
# Deterministic parameter init (Conv + eval-mode BatchNorm folded together)
# -----------------------------------------------------------------------------
def make_linear_bn(key, cin, cout, eps=1e-5):
    k1, k2, k3, k4 = jax.random.split(key, 4)
    w = jax.random.normal(k1, (cin, cout), jnp.float32) / math.sqrt(cin)
    b = 0.05 * jax.random.normal(k2, (cout,), jnp.float32)
    gamma = 1.0 + 0.1 * jax.random.normal(k3, (cout,), jnp.float32)
    beta = 0.05 * jax.random.normal(k4, (cout,), jnp.float32)
    scale = gamma / jnp.sqrt(1.0 + eps)        # running_mean=0, running_var=1
    wf = w * scale[None, :]
    bf = (b * scale + beta).reshape(1, cout)
    return wf, bf


def init_fem_params(key):
    chans = [1, 16, 32, 16, 1]
    keys = jax.random.split(key, 4)
    return [make_linear_bn(keys[i], chans[i], chans[i + 1]) for i in range(4)]


def init_mlp_params(key, mlps):
    keys = jax.random.split(key, len(mlps) - 1)
    return [make_linear_bn(keys[i], mlps[i], mlps[i + 1]) for i in range(len(mlps) - 1)]


# -----------------------------------------------------------------------------
if __name__ == "__main__":
    key = jax.random.PRNGKey(0)
    kx, kf, kp1, kp2 = jax.random.split(key, 4)

    B, N, C1 = 2, 64, 16
    mlps = [C1, 32, 64]
    npoint = 16
    density_list = [1.0, 1.0]
    sample_num = 8
    radiu = 0.3
    small = 0.2
    large = 0.4
    block_num = 2

    x = jax.random.uniform(kx, (B, N, 3), dtype=jnp.float32)
    feature = jax.random.normal(kf, (B, N, C1), dtype=jnp.float32)

    fem_layers = init_fem_params(kp1)
    mlp_layers = init_mlp_params(kp2, mlps)

    new_xyz, new_feature = layered_extract_forward(
        x, feature, fem_layers, mlp_layers,
        npoint=npoint, density_list=density_list, sample_num=sample_num,
        radiu=radiu, small=small, large=large, block_num=block_num)

    jax.block_until_ready((new_xyz, new_feature))
    assert new_xyz.shape == (B, npoint, 3)
    assert new_feature.shape == (B, npoint, mlps[-1])
    print("KERNEL_OK")
</pallas_src>

<mosaic_0001>
module attributes {stable_mosaic.version = 11 : i64} {
  func.func @_ball_idx_kernel(%arg0: i32, %arg1: i32, %arg2: i32, %arg3: memref<1x64x3xf32, #tpu.memory_space<vmem>>, %arg4: memref<1x64x1xf32, #tpu.memory_space<vmem>>, %arg5: memref<1x3x128xf32, #tpu.memory_space<vmem>>, %arg6: memref<1x1x128xf32, #tpu.memory_space<vmem>>, %arg7: memref<1x64x128xi32, #tpu.memory_space<vmem>>) attributes {dimension_semantics = [#tpu.dimension_semantics<parallel>, #tpu.dimension_semantics<parallel>, #tpu.dimension_semantics<parallel>], iteration_bounds = array<i64: 2, 1, 1>, scalar_prefetch = 0 : i64, scratch_operands = 0 : i64, tpu.core_type = #tpu.core_type<tc>, window_params = [{transform_indices = @transform_0, window_bounds = array<i64: 1, 64, 3>}, {transform_indices = @transform_1, window_bounds = array<i64: 1, 64, 1>}, {transform_indices = @transform_2, window_bounds = array<i64: 1, 3, 128>}, {transform_indices = @transform_3, window_bounds = array<i64: 1, 1, 128>}, {transform_indices = @transform_4, window_bounds = array<i64: 1, 64, 128>}]} {
    %c0 = arith.constant 0 : index
    %c0_0 = arith.constant 0 : index
    %c0_1 = arith.constant 0 : index
    %0 = vector.load %arg3[%c0, %c0_0, %c0_1] : memref<1x64x3xf32, #tpu.memory_space<vmem>>, vector<1x64x3xf32>
    %1 = vector.shape_cast %0 : vector<1x64x3xf32> to vector<64x3xf32>
    %c0_2 = arith.constant 0 : index
    %c0_3 = arith.constant 0 : index
    %c0_4 = arith.constant 0 : index
    %2 = vector.load %arg5[%c0_2, %c0_3, %c0_4] : memref<1x3x128xf32, #tpu.memory_space<vmem>>, vector<1x3x128xf32>
    %3 = vector.shape_cast %2 : vector<1x3x128xf32> to vector<3x128xf32>
    %c0_5 = arith.constant 0 : index
    %c0_6 = arith.constant 0 : index
    %c0_7 = arith.constant 0 : index
    %4 = vector.load %arg4[%c0_5, %c0_6, %c0_7] : memref<1x64x1xf32, #tpu.memory_space<vmem>>, vector<1x64x1xf32>
    %5 = vector.shape_cast %4 : vector<1x64x1xf32> to vector<64x1xf32>
    %c0_8 = arith.constant 0 : index
    %c0_9 = arith.constant 0 : index
    %c0_10 = arith.constant 0 : index
    %6 = vector.load %arg6[%c0_8, %c0_9, %c0_10] : memref<1x1x128xf32, #tpu.memory_space<vmem>>, vector<1x1x128xf32>
    %7 = vector.shape_cast %6 : vector<1x1x128xf32> to vector<1x128xf32>
    %8 = vector.broadcast %5 : vector<64x1xf32> to vector<64x128xf32>
    %9 = vector.broadcast %7 : vector<1x128xf32> to vector<64x128xf32>
    %10 = arith.addf %8, %9 : vector<64x128xf32>
    %11 = vector.extract_strided_slice %1 {offsets = [0, 0], sizes = [64, 1], strides = [1, 1]} : vector<64x3xf32> to vector<64x1xf32>
    %12 = vector.extract_strided_slice %3 {offsets = [0, 0], sizes = [1, 128], strides = [1, 1]} : vector<3x128xf32> to vector<1x128xf32>
    %13 = vector.broadcast %11 : vector<64x1xf32> to vector<64x128xf32>
    %14 = vector.broadcast %12 : vector<1x128xf32> to vector<64x128xf32>
    %15 = arith.mulf %13, %14 : vector<64x128xf32>
    %cst = arith.constant 2.000000e+00 : f32
    %16 = vector.broadcast %cst : f32 to vector<64x128xf32>
    %17 = arith.mulf %16, %15 : vector<64x128xf32>
    %18 = arith.subf %10, %17 : vector<64x128xf32>
    %19 = vector.extract_strided_slice %1 {offsets = [0, 1], sizes = [64, 1], strides = [1, 1]} : vector<64x3xf32> to vector<64x1xf32>
    %20 = vector.extract_strided_slice %3 {offsets = [1, 0], sizes = [1, 128], strides = [1, 1]} : vector<3x128xf32> to vector<1x128xf32>
    %21 = vector.broadcast %19 : vector<64x1xf32> to vector<64x128xf32>
    %22 = vector.broadcast %20 : vector<1x128xf32> to vector<64x128xf32>
    %23 = arith.mulf %21, %22 : vector<64x128xf32>
    %cst_11 = arith.constant 2.000000e+00 : f32
    %24 = vector.broadcast %cst_11 : f32 to vector<64x128xf32>
    %25 = arith.mulf %24, %23 : vector<64x128xf32>
    %26 = arith.subf %18, %25 : vector<64x128xf32>
    %27 = vector.extract_strided_slice %1 {offsets = [0, 2], sizes = [64, 1], strides = [1, 1]} : vector<64x3xf32> to vector<64x1xf32>
    %28 = vector.extract_strided_slice %3 {offsets = [2, 0], sizes = [1, 128], strides = [1, 1]} : vector<3x128xf32> to vector<1x128xf32>
    %29 = vector.broadcast %27 : vector<64x1xf32> to vector<64x128xf32>
    %30 = vector.broadcast %28 : vector<1x128xf32> to vector<64x128xf32>
    %31 = arith.mulf %29, %30 : vector<64x128xf32>
    %cst_12 = arith.constant 2.000000e+00 : f32
    %32 = vector.broadcast %cst_12 : f32 to vector<64x128xf32>
    %33 = arith.mulf %32, %31 : vector<64x128xf32>
    %34 = arith.subf %26, %33 : vector<64x128xf32>
    %35 = tpu.iota {dimensions = array<i32: 1>} : vector<64x128xi32>
    %c128_i32 = arith.constant 128 : i32
    %36 = arith.muli %arg2, %c128_i32 : i32
    %37 = vector.broadcast %36 : i32 to vector<64x128xi32>
    %38 = arith.addi %35, %37 : vector<64x128xi32>
    %cst_13 = arith.constant 4.000000e-02 : f32
    %39 = vector.broadcast %cst_13 : f32 to vector<64x128xf32>
    %40 = arith.cmpf ogt, %34, %39 : vector<64x128xf32>
    %c64_i32 = arith.constant 64 : i32
    %41 = vector.broadcast %c64_i32 : i32 to vector<64x128xi32>
    %42 = arith.select %40, %41, %38 : vector<64x128xi1>, vector<64x128xi32>
    %c0_14 = arith.constant 0 : index
    %c0_15 = arith.constant 0 : index
    %c0_16 = arith.constant 0 : index
    %43 = vector.load %arg7[%c0_14, %c0_15, %c0_16] : memref<1x64x128xi32, #tpu.memory_space<vmem>>, vector<1x64x128xi32>
    %44 = vector.shape_cast %43 : vector<1x64x128xi32> to vector<64x128xi32>
    %45 = vector.shape_cast %42 : vector<64x128xi32> to vector<1x64x128xi32>
    tpu.vector_store %arg7[%c0_14, %c0_15, %c0_16], %45 {strides = array<i32>} : memref<1x64x128xi32, #tpu.memory_space<vmem>>, vector<1x64x128xi32>,
    return
  }
  func.func @transform_0(%arg0: i32, %arg1: i32, %arg2: i32) -> (i32, i32, i32) {
    %c0_i32 = arith.constant 0 : i32
    %c0_i32_0 = arith.constant 0 : i32
    return %arg0, %arg1, %c0_i32 : i32, i32, i32
  }
  func.func @transform_1(%arg0: i32, %arg1: i32, %arg2: i32) -> (i32, i32, i32) {
    %c0_i32 = arith.constant 0 : i32
    %c0_i32_0 = arith.constant 0 : i32
    return %arg0, %arg1, %c0_i32 : i32, i32, i32
  }
  func.func @transform_2(%arg0: i32, %arg1: i32, %arg2: i32) -> (i32, i32, i32) {
    %c0_i32 = arith.constant 0 : i32
    %c0_i32_0 = arith.constant 0 : i32
    return %arg0, %c0_i32, %arg2 : i32, i32, i32
  }
  func.func @transform_3(%arg0: i32, %arg1: i32, %arg2: i32) -> (i32, i32, i32) {
    %c0_i32 = arith.constant 0 : i32
    %c0_i32_0 = arith.constant 0 : i32
    return %arg0, %c0_i32, %arg2 : i32, i32, i32
  }
  func.func @transform_4(%arg0: i32, %arg1: i32, %arg2: i32) -> (i32, i32, i32) {
    %c0_i32 = arith.constant 0 : i32
    return %arg0, %arg1, %arg2 : i32, i32, i32
  }
}

</mosaic_0001>

<bundles_post_ra>
// kernel: tpu_custom_call.1
= control target key start
LH: loop header
LB: loop body
LE: loop exit
PB: predicated region body
PF: predicated region fallthrough
CT: control target
= control target key end

     0   :  { %9 = vsyncpa [#allocation3], 0  ;;  %s1137_s0 = inlined_call_operand.vmem [shape: f32[2,64,3], index: 0, kind: input, shape index: {}]   ;;  %s1138_s1 = inlined_call_operand.vmem [shape: f32[2,64,1], index: 1, kind: input, shape index: {}]   ;;  %s1139_s2 = inlined_call_operand.vmem [shape: f32[2,3,128], index: 2, kind: input, shape index: {}]   ;;  %s1140_s3 = inlined_call_operand.vmem [shape: f32[2,1,128], index: 3, kind: input, shape index: {}]   ;;  %s1141_s4 = inlined_call_operand.hbm [shape: s32[2,64,128], index: 4, kind: output, shape index: {}]  }
   0x1   :  { %11 = vsyncpa [#allocation3 + $0x1], 0  ;;  %s948_s15 = smov 0   ;;  %s950_s16 = smov 0  }
   0x2   :  { %s952_s17 = smov 0   ;;  %s954_s18 = smov 0  }
   0x3   :  { %s956_s19 = smov 0   ;;  %s958_s20 = smov 0  }
   0x4 LB: > { %s749_s21 = sadd.s32 4294967295, %s916_s20   ;;  %s750_s22 = sadd.s32 4294967294, %s916_s20   ;;  %s916_s20 = sphi %s958_s20, %s17_s20   ;;  %s912_s19 = sphi %s956_s19, %s1148_s19   ;;  %s908_s18 = sphi %s954_s18, %s1147_s18   ;;  %s904_s17 = sphi %s952_s17, %s1146_s17   ;;  %s900_s16 = sphi %s950_s16, %s1145_s16   ;;  %s896_s15 = sphi %s948_s15, %s1144_s15  }
   0x5   : > { %s36_s23 = sadd.s32 1, %s912_s19  ;;  %s159_s24 = sadd.s32 1, %s904_s17 }
   0x6   : > { %p38_p0 = scmp.ge.s32.totalorder %s36_s23, 2  ;;  %p169_p1 = scmp.ne.s32.totalorder %s904_s17, %s900_s16 }
   0x7   : > { %p170_p2 = scmp.eq.s32.totalorder %s749_s21, 1  ;;  %p175_p3 = scmp.ne.s32.totalorder %s900_s16, %s896_s15 }
   0x8   : > { %s1150_s23 = smov (%p38_p0, %s36_s23), 0  ;;  %p176_p5 = scmp.eq.s32.totalorder %s750_s22, 1 }
   0x9   : > { %p988_p4 = por %p170_p2, %p169_p1  ;;  %s152_s26 = ssub.s32 %s912_s19, %s1150_s23 }
   0xa   : > { %p753_p6 = scmp.ge.s32.totalorder %s916_s20, 1  ;;  %p157_p7 = scmp.eq.s32.totalorder %s152_s26, 0 }
   0xb   : > { %p995_p8 = por %p176_p5, %p175_p3  ;;  %p239_p9 = scmp.lt.s32.totalorder %s916_s20, 3 }
   0xc   : > { %s1001_s28 = scalar_select %p157_p7, %s904_s17, %s159_s24  }
   0xd   : > { %p240_p10 = pnand %p753_p6, %p239_p9 }
   0xe   : > { %p292_p11 = scmp.lt.s32.totalorder (!%p240_p10), %s908_s18, 1  ;;  %s858_s24 = scalar_lea.hbm (!%p240_p10), %s1141_s4, 128 }
   0xf   : > { %243 = sbr.rel (%p240_p10) target bundleno = 234 (0xea), region = 36 }
  0x14   : > { %v918_v0 = vmov 0   ;;  %s1005_s29 = scalar_select %p292_p11, %s908_s18, 1  ;;  %v919_v17 = vmov 1   ;;  %v920_v18 = vmov 2  }
  0x15   : > { %830 = vset.pattern.permute.xlu2 %v918_v0  ;;  %829 = vset.pattern.permute.xlu1 %v918_v0 }
  0x16   : > { %828 = vset.pattern.permute.xlu0 %v918_v0  ;;  %s765_s30 = sshll.u32 %s1005_s29, 6  ;;  %s323_s10 = scalar_lea.vmem %s1140_s3, %s1005_s29 }
  0x17   : > { %s309_s7 = scalar_lea.vmem %s1138_s1, %s765_s30  ;;  %s299_s13 = scalar_lea.vmem %s1137_s0, %s765_s30  ;;  %v1023_v19 = vld [vmem:[%s323_s10] ss:$0 sm:$0xff] }
  0x18   : > { %v338_v1 = vld [vmem:[%s309_s7 + $0x20] sm:$0xff]  ;;  %v336_v2 = vld [vmem:[%s309_s7 + $0x10] sm:$0xff]  ;;  %v339_v4 = vld [vmem:[%s309_s7 + $0x28] sm:$0xff]  ;;  %s759_s22 = sshll.u32 %s1005_s29, 2  ;;  %s288_s29 = sand.u32 1, %s900_s16  }
  0x19   : > { %365 = vperm.xlu2 %830, %v338_v1   ;;  %355 = vperm.xlu1 %829, %v336_v2   ;;  %v334_v3 = vld [vmem:[%s309_s7] sm:$0xff]  ;;  %v337_v5 = vld [vmem:[%s309_s7 + $0x18] sm:$0xff]  ;;  %v335_v6 = vld [vmem:[%s309_s7 + $0x8] sm:$0xff]  ;;  %s317_s30 = scalar_lea.vmem %s1139_s2, %s759_s22  ;;  %s754_s5 = sshll.u32 %s288_s29, 6 }
  0x1a   : > { %345 = vperm.xlu0 %828, %v334_v3   ;;  %v341_v7 = vld [vmem:[%s309_s7 + $0x38] sm:$0xff]  ;;  %v325_v8 = vld [vmem:[%s299_s13] sm:$0xff]  ;;  %v340_v9 = vld [vmem:[%s309_s7 + $0x30] sm:$0xff]  ;;  %s1068_s6 = scalar_lea.vmem [#allocation2], %s754_s5  ;;  %s767_s7 = sshll.u32 %s908_s18, 6 }
  0x1b   : > { %v327_v10 = vld [vmem:[%s299_s13 + $0x10] sm:$0xff]  ;;  %v328_v11 = vld [vmem:[%s299_s13 + $0x18] sm:$0xff]  ;;  %v326_v12 = vld [vmem:[%s299_s13 + $0x8] sm:$0xff]  ;;  %s617_s10 = scalar_lea.hbm %s1141_s4, %s767_s7  ;;  %s618_s18 = sshll.u32 %s1068_s6, 4  ;;  %s619_s18 = int_to_ptr.vmem [resolvable:$true] %s618_s18 }
  0x1c   : > { %v330_v13 = vld [vmem:[%s299_s13 + $0x28] sm:$0xff]  ;;  %v331_v14 = vld [vmem:[%s299_s13 + $0x30] sm:$0xff]  ;;  %v329_v15 = vld [vmem:[%s299_s13 + $0x20] sm:$0xff]  ;;  %s620_s11 = sshll.u32 %s617_s10, 4  ;;  %s603_s12 = scalar_lea.sflag [#allocation3], %s288_s29  ;;  %s621_s11 = int_to_ptr.hbm [resolvable:$true] %s620_s11 }
  0x1d   : > { %v332_v16 = vld [vmem:[%s299_s13 + $0x38] sm:$0xff]  ;;  %v333_v24 = vld [vmem:[%s317_s30] sm:$0x7]  ;;  %s852_s13 = sshra.s32 %s621_s11, 4  ;;  %s853_s13 = int_to_ptr.hbm [resolvable:$true] %s852_s13 }
  0x1e   : > { %v434_v25 = vperm.slane %v333_v24, 0  ;;  %v1048_v48 = vperm.slane %v333_v24, 1  ;;  %s854_s14 = scalar_lea.hbm %s853_s13, 64  ;;  %p859_p1 = scmp.lt.s32.totalorder %s853_s13, %s1141_s4 }
  0x1f   : > { %p855_p12 = scmp.ne.s32.totalorder %s853_s13, %s854_s14  ;;  %p860_p2 = scmp.lt.s32.totalorder %s858_s24, %s854_s14 }
  0x21   : > { %370 = vperm.xlu2 %830, %v339_v4   ;;  %360 = vperm.xlu1 %829, %v337_v5   ;;  %p856_p13 = pnand %p855_p12, %p988_p4  ;;  %p861_p3 = por %p860_p2, %p859_p1 }
  0x22   : > { %350 = vperm.xlu0 %828, %v335_v6  }
  0x23   : > { %p857_p0 = pneg %p856_p13 }
  0x25   : > { %p862_p5 = pnand %p861_p3, %p857_p0 }
  0x29   : > { %380 = vperm.xlu1 %829, %v341_v7   ;;  %396 = vperm.xlu2 %830, %v325_v8  }
  0x2a   : > { %375 = vperm.xlu0 %828, %v340_v9  }
  0x31   : > { %406 = vperm.xlu1 %829, %v327_v10   ;;  %411 = vperm.xlu2 %830, %v328_v11  }
  0x32   : > { %401 = vperm.xlu0 %828, %v326_v12  }
  0x39   : > { %421 = vperm.xlu1 %829, %v330_v13   ;;  %426 = vperm.xlu2 %830, %v331_v14  }
  0x3a   : > { %416 = vperm.xlu0 %828, %v329_v15  }
  0x41   : > { %831 = vset.pattern.permute.xlu1 %v919_v17  ;;  %832 = vset.pattern.permute.xlu2 %v919_v17 }
  0x42   : > { %460 = vperm.xlu1 %831, %v325_v8   ;;  %464 = vperm.xlu2 %832, %v326_v12  }
  0x43   : > { %431 = vperm.xlu0 %828, %v332_v16  }
  0x4a   : > { %472 = vperm.xlu1 %831, %v328_v11   ;;  %476 = vperm.xlu2 %832, %v329_v15  }
  0x4b   : > { %833 = vset.pattern.permute.xlu0 %v919_v17 }
  0x4c   : > { %468 = vperm.xlu0 %833, %v327_v10  }
  0x52   : > { %480 = vperm.xlu1 %831, %v330_v13   ;;  %484 = vperm.xlu2 %832, %v331_v14  }
  0x54   : > { %488 = vperm.xlu0 %833, %v332_v16  }
  0x5a   : > { %834 = vset.pattern.permute.xlu1 %v920_v18  ;;  %835 = vset.pattern.permute.xlu2 %v920_v18 }
  0x5b   : > { %517 = vperm.xlu1 %834, %v325_v8   ;;  %521 = vperm.xlu2 %835, %v326_v12   ;;  %v1056_v12 = vperm.slane %v333_v24, 2 }
  0x5c   : > { %836 = vset.pattern.permute.xlu0 %v920_v18  ;;  %v573_v18 = vlaneseq }
  0x5d   : > { %525 = vperm.xlu0 %836, %v327_v10  }
  0x63   : > { %529 = vperm.xlu1 %834, %v328_v11   ;;  %533 = vperm.xlu2 %835, %v329_v15  }
  0x65   : > { %545 = vperm.xlu0 %836, %v332_v16  }
  0x6b   : > { %537 = vperm.xlu1 %834, %v330_v13   ;;  %541 = vperm.xlu2 %835, %v331_v14  }
  0x73   : > { %v366_v20 = vpop.permute.xlu2 %365 }
  0x74   : > { %v390_v21 = vadd.f32 %v1023_v19, %v366_v20 }
  0x7b   : > { %v371_v22 = vpop.permute.xlu2 %370 }
  0x7c   : > { %v1031_v23 = vadd.f32 %v1023_v19, %v371_v22 }
  0x83   : > { %v397_v26 = vpop.permute.xlu2 %396 }
  0x84   : > { %v435_v27 = vmul.f32 %v434_v25, %v397_v26 }
  0x86   : > { %v1033_v30 = vmul.f32 2.0, %v435_v27 }
  0x8b   : > { %v356_v28 = vpop.permute.xlu1 %355  ;;  %v412_v29 = vpop.permute.xlu2 %411 }
  0x8c   : > { %v1036_v31 = vadd.f32 %v1023_v19, %v356_v28  ;;  %v438_v32 = vmul.f32 %v434_v25, %v412_v29  ;;  %v346_v33 = vpop.permute.xlu0 %345 }
  0x8d   : > { %v386_v34 = vadd.f32 %v1023_v19, %v346_v33 }
  0x8e   : > { %v1040_v38 = vmul.f32 2.0, %v438_v32 }
  0x8f   : > { %v451_v35 = vsub.f32 %v386_v34, %v1033_v30 }
  0x93   : > { %v361_v36 = vpop.permute.xlu1 %360  ;;  %v427_v37 = vpop.permute.xlu2 %426 }
  0x94   : > { %v1043_v39 = vadd.f32 %v1023_v19, %v361_v36  ;;  %v351_v40 = vpop.permute.xlu0 %350  ;;  %v441_v42 = vmul.f32 %v434_v25, %v427_v37 }
  0x95   : > { %v387_v57 = vadd.f32 %v1023_v19, %v351_v40 }
  0x96   : > { %v454_v41 = vsub.f32 %v1043_v39, %v1040_v38  ;;  %v449_v46 = vmul.f32 2.0, %v441_v42 }
  0x9b   : > { %v381_v43 = vpop.permute.xlu1 %380 }
  0x9c   : > { %v465_v44 = vpop.permute.xlu2 %464  ;;  %v376_v45 = vpop.permute.xlu0 %375 }
  0x9d   : > { %v392_v47 = vadd.f32 %v1023_v19, %v376_v45  ;;  %v493_v51 = vmul.f32 %v1048_v48, %v465_v44 }
  0x9f   : > { %v457_v49 = vsub.f32 %v392_v47, %v449_v46  ;;  %v501_v58 = vmul.f32 2.0, %v493_v51 }
  0xa3   : > { %v407_v50 = vpop.permute.xlu1 %406 }
  0xa4   : > { %v437_v52 = vmul.f32 %v434_v25, %v407_v50  ;;  %v477_v53 = vpop.permute.xlu2 %476  ;;  %v402_v54 = vpop.permute.xlu0 %401 }
  0xa5   : > { %v436_v56 = vmul.f32 %v434_v25, %v402_v54  ;;  %v496_v63 = vmul.f32 %v1048_v48, %v477_v53 }
  0xa6   : > { %v445_v55 = vmul.f32 2.0, %v437_v52 }
  0xa7   : > { %v444_v60 = vmul.f32 2.0, %v436_v56  ;;  %v504_v8 = vmul.f32 2.0, %v496_v63 }
  0xa8   : > { %v453_v59 = vsub.f32 %v1036_v31, %v445_v55 }
  0xa9   : > { %v452_v61 = vsub.f32 %v387_v57, %v444_v60 }
  0xab   : > { %v422_v62 = vpop.permute.xlu1 %421  ;;  %v509_v2 = vsub.f32 %v452_v61, %v501_v58 }
  0xac   : > { %v440_v0 = vmul.f32 %v434_v25, %v422_v62  ;;  %v485_v1 = vpop.permute.xlu2 %484  ;;  %v417_v3 = vpop.permute.xlu0 %416 }
  0xad   : > { %v498_v4 = vmul.f32 %v1048_v48, %v485_v1  ;;  %v439_v6 = vmul.f32 %v434_v25, %v417_v3 }
  0xae   : > { %v448_v5 = vmul.f32 2.0, %v440_v0 }
  0xaf   : > { %v506_v7 = vmul.f32 2.0, %v498_v4  ;;  %v447_v10 = vmul.f32 2.0, %v439_v6 }
  0xb0   : > { %v456_v9 = vsub.f32 %v1031_v23, %v448_v5  ;;  %v393_v23 = vadd.f32 %v1023_v19, %v381_v43 }
  0xb1   : > { %v514_v11 = vsub.f32 %v457_v49, %v506_v7  ;;  %v455_v13 = vsub.f32 %v390_v21, %v447_v10  ;;  %v1064_v21 = vand.u32 127, %v573_v18 }
  0xb3   : > { %v512_v15 = vsub.f32 %v455_v13, %v504_v8 }
  0xb4   : > { %v461_v14 = vpop.permute.xlu1 %460 }
  0xb5   : > { %v432_v16 = vpop.permute.xlu0 %431  ;;  %v492_v17 = vmul.f32 %v1048_v48, %v461_v14  ;;  %v522_v20 = vpop.permute.xlu2 %521 }
  0xb6   : > { %v442_v22 = vmul.f32 %v434_v25, %v432_v16  ;;  %v550_v26 = vmul.f32 %v1056_v12, %v522_v20 }
  0xb7   : > { %v500_v27 = vmul.f32 2.0, %v492_v17 }
  0xb8   : > { %v450_v28 = vmul.f32 2.0, %v442_v22  ;;  %v558_v24 = vmul.f32 2.0, %v550_v26 }
  0xb9   : > { %v508_v29 = vsub.f32 %v451_v35, %v500_v27 }
  0xba   : > { %v458_v30 = vsub.f32 %v393_v23, %v450_v28  ;;  %v566_v31 = vsub.f32 %v509_v2, %v558_v24 }
  0xbc   : > { %vm579_vm0 = vcmp.gt.f32.partialorder %v566_v31, 0.04  ;;  %v473_v32 = vpop.permute.xlu1 %472 }
  0xbd   : > { %v587_v33 = vsel %vm579_vm0, 64, %v1064_v21  ;;  %v495_v25 = vmul.f32 %v1048_v48, %v473_v32  ;;  %v534_v34 = vpop.permute.xlu2 %533 }
  0xbe   : > { %595 = vst [vmem:[%s1068_s6 + $0x8] sm:$0xff] %v587_v33  ;;  %v469_v19 = vpop.permute.xlu0 %468  ;;  %v553_v36 = vmul.f32 %v1056_v12, %v534_v34 }
  0xbf   : > { %v494_v35 = vmul.f32 %v1048_v48, %v469_v19  ;;  %v503_v37 = vmul.f32 2.0, %v495_v25 }
  0xc0   : > { %v561_v40 = vmul.f32 2.0, %v553_v36 }
  0xc1   : > { %v502_v42 = vmul.f32 2.0, %v494_v35  ;;  %v511_v43 = vsub.f32 %v454_v41, %v503_v37 }
  0xc2   : > { %v569_v44 = vsub.f32 %v512_v15, %v561_v40 }
  0xc3   : > { %v510_v45 = vsub.f32 %v453_v59, %v502_v42 }
  0xc4   : > { %vm582_vm1 = vcmp.gt.f32.partialorder %v569_v44, 0.04  ;;  %v481_v46 = vpop.permute.xlu1 %480 }
  0xc5   : > { %v590_v47 = vsel %vm582_vm1, 64, %v1064_v21  ;;  %v497_v49 = vmul.f32 %v1048_v48, %v481_v46  ;;  %v542_v50 = vpop.permute.xlu2 %541 }
  0xc6   : > { %598 = vst [vmem:[%s1068_s6 + $0x20] sm:$0xff] %v590_v47  ;;  %v489_v51 = vpop.permute.xlu0 %488  ;;  %v555_v52 = vmul.f32 %v1056_v12, %v542_v50 }
  0xc7   : > { %v499_v53 = vmul.f32 %v1048_v48, %v489_v51  ;;  %v505_v54 = vmul.f32 2.0, %v497_v49 }
  0xc8   : > { %v563_v55 = vmul.f32 2.0, %v555_v52 }
  0xc9   : > { %v507_v38 = vmul.f32 2.0, %v499_v53  ;;  %v513_v39 = vsub.f32 %v456_v9, %v505_v54 }
  0xca   : > { %v571_v41 = vsub.f32 %v514_v11, %v563_v55 }
  0xcb   : > { %v515_v56 = vsub.f32 %v458_v30, %v507_v38 }
  0xcc   : > { %vm584_vm2 = vcmp.gt.f32.partialorder %v571_v41, 0.04 }
  0xcd   : > { %v592_v57 = vsel %vm584_vm2, 64, %v1064_v21  ;;  %v518_v58 = vpop.permute.xlu1 %517 }
  0xce   : > { %600 = vst [vmem:[%s1068_s6 + $0x30] sm:$0xff] %v592_v57  ;;  %v549_v59 = vmul.f32 %v1056_v12, %v518_v58 }
  0xcf   : > { %v526_v60 = vpop.permute.xlu0 %525 }
  0xd0   : > { %v551_v61 = vmul.f32 %v1056_v12, %v526_v60  ;;  %v557_v62 = vmul.f32 2.0, %v549_v59 }
  0xd2   : > { %v559_v48 = vmul.f32 2.0, %v551_v61  ;;  %v565_v63 = vsub.f32 %v508_v29, %v557_v62 }
  0xd4   : > { %v567_v0 = vsub.f32 %v510_v45, %v559_v48  ;;  %vm578_vm3 = vcmp.gt.f32.partialorder %v565_v63, 0.04 }
  0xd5   : > { %v586_v1 = vsel %vm578_vm3, 64, %v1064_v21  ;;  %v530_v2 = vpop.permute.xlu1 %529 }
  0xd6   : > { %vm580_vm4 = vcmp.gt.f32.partialorder %v567_v0, 0.04  ;;  %594 = vst [vmem:[%s1068_s6] sm:$0xff] %v586_v1  ;;  %v552_v3 = vmul.f32 %v1056_v12, %v530_v2 }
  0xd7   : > { %v588_v4 = vsel %vm580_vm4, 64, %v1064_v21  ;;  %v546_v5 = vpop.permute.xlu0 %545 }
  0xd8   : > { %596 = vst [vmem:[%s1068_s6 + $0x10] sm:$0xff] %v588_v4  ;;  %v556_v6 = vmul.f32 %v1056_v12, %v546_v5  ;;  %v560_v7 = vmul.f32 2.0, %v552_v3 }
  0xda   : > { %v564_v8 = vmul.f32 2.0, %v556_v6  ;;  %v568_v9 = vsub.f32 %v511_v43, %v560_v7 }
  0xdc   : > { %v572_v10 = vsub.f32 %v515_v56, %v564_v8  ;;  %vm581_vm5 = vcmp.gt.f32.partialorder %v568_v9, 0.04 }
  0xdd   : > { %v589_v11 = vsel %vm581_vm5, 64, %v1064_v21  ;;  %v538_v13 = vpop.permute.xlu1 %537 }
  0xde   : > { %vm585_vm6 = vcmp.gt.f32.partialorder %v572_v10, 0.04  ;;  %597 = vst [vmem:[%s1068_s6 + $0x18] sm:$0xff] %v589_v11  ;;  %v554_v14 = vmul.f32 %v1056_v12, %v538_v13 }
  0xdf   : > { %v593_v15 = vsel %vm585_vm6, 64, %v1064_v21 }
  0xe0   : > { %601 = vst [vmem:[%s1068_s6 + $0x38] sm:$0xff] %v593_v15  ;;  %v562_v16 = vmul.f32 2.0, %v554_v14 }
  0xe2   : > { %v570_v17 = vsub.f32 %v513_v39, %v562_v16 }
  0xe4   : > { %vm583_vm7 = vcmp.gt.f32.partialorder %v570_v17, 0.04 }
  0xe5   : > { %v591_v18 = vsel %vm583_vm7, 64, %v1064_v21 }
  0xe6   : > { %599 = vst [vmem:[%s1068_s6 + $0x28] sm:$0xff] %v591_v18 }
  0xe7   : > { %865 = shalt.err (!%p862_p5)
}
  0xe8   : > { %s921_s29 = smov 128   ;;  %s922_s5 = smov 8  }
  0xe9   : > { %768 = dma.vmem_to_hbm [thread:$0]  (%p988_p4), %s619_s18, 1024, %s621_s11, %s603_s12, %s921_s29, %s921_s29, %s922_s5  }
  0xea PF: > { %p774_p6 = scmp.ge.s32.totalorder %s916_s20, 2  ;;  %s635_s6 = sand.u32 1, %s896_s15  }
  0xeb   : > { %s636_s7 = scalar_lea.sflag [#allocation3], %s635_s6 }
  0xec   : > { %p771_p7 = pnand %p774_p6, %p995_p8 }
  0xee   : > { %p772_p9 = pneg %p771_p7 }
  0xf0   : > { %891 = dma.done.wait (%p772_p9), %s636_s7, 1024  }
  0xf1   : > { %893 = vsyncadd (%p772_p9), %s636_s7, 4294966272  ;;  %s17_s20 = sadd.s32 1, %s916_s20   ;;  %s1144_s15 = smov %s900_s16 }
  0xf2   : > { %p14_p10 = scmp.ge.s32.totalorder %s17_s20, 4   ;;  %s1145_s16 = smov %s904_s17 }
  0xf3   : > { %s1146_s17 = smov %s1001_s28  ;;  %s1147_s18 = smov %s912_s19 }
  0xf4   : > { %s1148_s19 = smov %s1150_s23  ;;  %16 = sbr.rel (!%p14_p10) target bundleno = 4 (0x4), region = 80 }
  0xf9   :  { %642 = vsyncpa [#allocation3], 1 }
  0xfa   :  { %644 = vsyncpa [#allocation3 + $0x1], 1 }

</bundles_post_ra>
